<compile_context>
chip_gen: v7x
topology: tpu7x:2x2x1
jax: 0.10.0
libtpu: 0.0.40
codegen_flags: <defaults>
</compile_context>

<pallas_src>
import functools

import jax
import jax.numpy as jnp
from jax.experimental import pallas as pl
from jax.experimental.pallas import tpu as pltpu


_COMPUTE_DTYPE = jnp.bfloat16


# ----------------------------------------------------------------------------
# Kernel 1: fused nearest-2x upsample + 3x3 stride-1 "same" Conv2d (one frame
# per grid step, subpixel decomposition).
# ----------------------------------------------------------------------------
def _fused_upsample_conv_kernel(x_ref, w_ref, b_ref, o_ref, xp_ref):
    # x_ref : (H, W, Cin)          low-res input frame
    # w_ref : (2, 2, Cin, 4*Cout)  collapsed subpixel weights [row parity, row tap]
    # b_ref : (1, Cout)            f32 bias
    # o_ref : (H, 2, W, 2*Cout)    interleaved output; free reshape to (2H,2W,Cout)
    # xp_ref: ((H+2)*W, Cin)       bf16 scratch: row-padded low-res frame, rows flat
    H, W, Cin = x_ref.shape
    Cout = b_ref.shape[1]
    HW = H * W

    # Build the row-padded frame in VMEM.  The pad rows are re-zeroed every grid
    # step so the kernel stays correct under "parallel" (megacore) sharding.
    zpad = jnp.zeros((W, Cin), xp_ref.dtype)
    xp_ref[0:W, :] = zpad
    xp_ref[(H + 1) * W:(H + 2) * W, :] = zpad
    xp_ref[W:(H + 1) * W, :] = x_ref[...].reshape(HW, Cin).astype(xp_ref.dtype)

    bias = b_ref[...].astype(jnp.float32)                       # (1, Cout)

    # Column-edge masks on the flattened row-major (H*W) index.
    col = jax.lax.broadcasted_iota(jnp.int32, (HW, 1), 0) % W
    not_first_col = col != 0
    not_last_col = col != (W - 1)
    zrow = jnp.zeros((1, Cout), jnp.float32)

    for a in range(2):                          # output row parity (rows 2i + a)
        acc_e = jnp.zeros((HW, Cout), jnp.float32)    # even output columns (2j)
        acc_o = jnp.zeros((HW, Cout), jnp.float32)    # odd  output columns (2j+1)
        for t in range(2):                      # the two collapsed row taps
            lhs = xp_ref[(a + t) * W:(a + t + H) * W, :]         # (H*W, Cin) slab
            r = jnp.dot(lhs, w_ref[a, t],
                        preferred_element_type=jnp.float32)      # (H*W, 4*Cout)
            r_em1 = r[:, 0 * Cout:1 * Cout]     # even cols, column tap -1
            r_e0 = r[:, 1 * Cout:2 * Cout]      # even cols, column tap  0
            r_o0 = r[:, 2 * Cout:3 * Cout]      # odd  cols, column tap  0
            r_op1 = r[:, 3 * Cout:4 * Cout]     # odd  cols, column tap +1
            # One-low-res-column shift (flat sublane shift) + frame-edge masking.
            sh_m1 = jnp.concatenate([zrow, r_em1[:HW - 1, :]], axis=0)
            sh_p1 = jnp.concatenate([r_op1[1:, :], zrow], axis=0)
            acc_e = acc_e + r_e0 + jnp.where(not_first_col, sh_m1, 0.0)
            acc_o = acc_o + r_o0 + jnp.where(not_last_col, sh_p1, 0.0)
        o_ref[:, a, :, 0:Cout] = (
            (acc_e + bias).reshape(H, W, Cout).astype(o_ref.dtype))
        o_ref[:, a, :, Cout:2 * Cout] = (
            (acc_o + bias).reshape(H, W, Cout).astype(o_ref.dtype))


# ----------------------------------------------------------------------------
# Kernel 2: plain nearest-2x spatial upsample (with_conv=False path).
# ----------------------------------------------------------------------------
def _upsample2x_kernel(x_ref, o_ref):
    # x_ref: (H, W, C)   o_ref: (H, 2, W, 2*C); out[i, a, j, b*C:(b+1)*C] = x[i, j]
    C = x_ref.shape[-1]
    x = x_ref[...]
    for a in range(2):
        o_ref[:, a, :, 0:C] = x
        o_ref[:, a, :, C:2 * C] = x


# ----------------------------------------------------------------------------
# pallas_call wrappers (grid = (B, T_out); temporal mapping via index_map)
# ----------------------------------------------------------------------------
def _fused_upconv_frames(xf, w_grouped, bias2d, t_map, t_out):
    B, _, H, W, C = xf.shape
    Cout = bias2d.shape[-1]
    out = pl.pallas_call(
        _fused_upsample_conv_kernel,
        out_shape=jax.ShapeDtypeStruct((B, t_out, H, 2, W, 2 * Cout), xf.dtype),
        grid_spec=pltpu.PrefetchScalarGridSpec(
            num_scalar_prefetch=0,
            grid=(B, t_out),
            in_specs=[
                pl.BlockSpec((None, None, H, W, C),
                             lambda b, t: (b, t_map(t), 0, 0, 0)),
                pl.BlockSpec((2, 2, C, 4 * Cout), lambda b, t: (0, 0, 0, 0)),
                pl.BlockSpec((1, Cout), lambda b, t: (0, 0)),
            ],
            out_specs=pl.BlockSpec((None, None, H, 2, W, 2 * Cout),
                                   lambda b, t: (b, t, 0, 0, 0, 0)),
            scratch_shapes=[pltpu.VMEM(((H + 2) * W, C), _COMPUTE_DTYPE)],
        ),
        compiler_params=pltpu.CompilerParams(
            dimension_semantics=("parallel", "parallel")),
    )(xf, w_grouped, bias2d)
    # contiguous (free) reshape: (B,T',H,2,W,2C) == (B,T',2H,2W,C)
    return out.reshape(B, t_out, 2 * H, 2 * W, Cout)


def _upsample2x_frames(xf, t_map, t_out):
    B, _, H, W, C = xf.shape
    out = pl.pallas_call(
        _upsample2x_kernel,
        out_shape=jax.ShapeDtypeStruct((B, t_out, H, 2, W, 2 * C), xf.dtype),
        grid_spec=pltpu.PrefetchScalarGridSpec(
            num_scalar_prefetch=0,
            grid=(B, t_out),
            in_specs=[pl.BlockSpec((None, None, H, W, C),
                                   lambda b, t: (b, t_map(t), 0, 0, 0))],
            out_specs=pl.BlockSpec((None, None, H, 2, W, 2 * C),
                                   lambda b, t: (b, t, 0, 0, 0, 0)),
        ),
        compiler_params=pltpu.CompilerParams(
            dimension_semantics=("parallel", "parallel")),
    )(xf)
    return out.reshape(B, t_out, 2 * H, 2 * W, C)


# ----------------------------------------------------------------------------
# Upsample3D forward
# ----------------------------------------------------------------------------
@functools.partial(jax.jit, static_argnames=("with_conv", "compress_time"))
def upsample3d_forward(x, params, *, with_conv, compress_time):
    B, C, T, H, W = x.shape
    xf = jnp.transpose(x, (0, 2, 3, 4, 1))               # (B, T, H, W, C)
    if compress_time and T > 1:
        t_out = 2 * T - 1
        t_map = lambda t: (t + 1) // 2     # frame 0 kept single, rest repeated 2x
    else:
        t_out = T
        t_map = lambda t: t
    if with_conv:
        frames = _fused_upconv_frames(xf, params["w_grouped"], params["b2d"],
                                      t_map, t_out)
    else:
        frames = _upsample2x_frames(xf, t_map, t_out)
    return jnp.transpose(frames, (0, 4, 1, 2, 3))        # (B, C, T', 2H, 2W)


# ----------------------------------------------------------------------------
# Weight preprocessing (once per weight update) and init
# ----------------------------------------------------------------------------
def _group_subpixel_weights(w_hwio):
    # w_hwio: (3, 3, Cin, Cout) -> (2, 2, Cin, 4*Cout) collapsed weights for
    # "3x3 conv after nearest-2x upsample" (subpixel / transposed-conv identity).
    w = w_hwio.astype(jnp.float32)
    row_taps = {0: (w[0], w[1] + w[2]),      # even output rows: row offsets (-1, 0)
                1: (w[0] + w[1], w[2])}      # odd  output rows: row offsets (0, +1)
    groups = []
    for a in (0, 1):
        per_tap = []
        for v in row_taps[a]:                # v: (3, Cin, Cout), indexed by dx
            per_tap.append(jnp.concatenate(
                [v[0],               # even output cols, column offset -1
                 v[1] + v[2],        # even output cols, column offset  0
                 v[0] + v[1],        # odd  output cols, column offset  0
                 v[2]],              # odd  output cols, column offset +1
                axis=-1))                    # (Cin, 4*Cout)
        groups.append(jnp.stack(per_tap, axis=0))        # (2, Cin, 4*Cout)
    return jnp.stack(groups, axis=0)                     # (2, 2, Cin, 4*Cout)


def init_params(key, in_channels):
    # Matches PyTorch Conv2d(in, in, 3, padding=1) default init shapes/bounds.
    k1, k2 = jax.random.split(key)
    fan_in = in_channels * 9
    bound = 1.0 / (fan_in ** 0.5)
    w_oihw = jax.random.uniform(k1, (in_channels, in_channels, 3, 3),
                                jnp.float32, -bound, bound)
    b = jax.random.uniform(k2, (in_channels,), jnp.float32, -bound, bound)
    w_hwio = jnp.transpose(w_oihw, (2, 3, 1, 0))
    return {
        "w_oihw": w_oihw,                                      # reference
        "b": b,                                                # reference
        "w_grouped": _group_subpixel_weights(w_hwio).astype(_COMPUTE_DTYPE),
        "b2d": b.reshape(1, in_channels).astype(jnp.float32),
    }


# ----------------------------------------------------------------------------
# Pure-JAX reference (mirrors the PyTorch forward) for correctness checks
# ----------------------------------------------------------------------------
def reference_forward(x, params, *, with_conv, compress_time):
    def sp_up(v):        # nearest-2x on the last two dims
        return jnp.repeat(jnp.repeat(v, 2, axis=-2), 2, axis=-1)

    B, C, T, H, W = x.shape
    if compress_time:
        if T > 1:
            xf = sp_up(x[:, :, 0])[:, :, None]
            xr = jnp.repeat(sp_up(x[:, :, 1:]), 2, axis=2)
            x = jnp.concatenate([xf, xr], axis=2)
        else:
            x = sp_up(x[:, :, 0])[:, :, None]
    else:
        x = sp_up(x)
    if with_conv:
        B_, C_, T2, H2, W2 = x.shape
        f = x.transpose(0, 2, 1, 3, 4).reshape(B_ * T2, C_, H2, W2)
        f = jax.lax.conv_general_dilated(
            f, params["w_oihw"], window_strides=(1, 1),
            padding=((1, 1), (1, 1)),
            dimension_numbers=("NCHW", "OIHW", "NCHW"),
            precision=jax.lax.Precision.HIGHEST)
        f = f + params["b"][None, :, None, None]
        x = f.reshape(B_, T2, C_, H2, W2).transpose(0, 2, 1, 3, 4)
    return x


if __name__ == "__main__":
    key = jax.random.PRNGKey(0)
    kx, kp = jax.random.split(key)
    B, C, T, H, W = 2, 32, 3, 8, 8
    x = jax.random.normal(kx, (B, C, T, H, W), jnp.float32)
    params = init_params(kp, C)

    cases = [(x, False), (x, True), (x[:, :, 0:1], True)]   # incl. T==1 compress
    for xi, compress_time in cases:
        # with_conv=False: pure nearest-neighbour upsample, exact match expected
        out_nc = jax.block_until_ready(
            upsample3d_forward(xi, params, with_conv=False,
                               compress_time=compress_time))
        ref_nc = reference_forward(xi, params, with_conv=False,
                                   compress_time=compress_time)
        assert out_nc.shape == ref_nc.shape, (out_nc.shape, ref_nc.shape)
        assert float(jnp.max(jnp.abs(out_nc - ref_nc))) < 1e-6

        # with_conv=True: bf16 MXU matmuls with f32 accumulation vs f32 reference
        out = jax.block_until_ready(
            upsample3d_forward(xi, params, with_conv=True,
                               compress_time=compress_time))
        ref = reference_forward(xi, params, with_conv=True,
                                compress_time=compress_time)
        assert out.shape == ref.shape, (out.shape, ref.shape)
        err = float(jnp.max(jnp.abs(out - ref)))
        assert err < 6e-2, err

    print("KERNEL_OK")
</pallas_src>

<mosaic_0001>
module attributes {stable_mosaic.version = 11 : i64} {
  func.func @_upsample2x_kernel(%arg0: i32, %arg1: i32, %arg2: memref<1x1x8x8x32xf32, #tpu.memory_space<vmem>>, %arg3: memref<1x1x8x2x8x64xf32, #tpu.memory_space<vmem>>) attributes {dimension_semantics = [#tpu.dimension_semantics<parallel>, #tpu.dimension_semantics<parallel>], iteration_bounds = array<i64: 2, 3>, scalar_prefetch = 0 : i64, scratch_operands = 0 : i64, tpu.core_type = #tpu.core_type<tc>, window_params = [{transform_indices = @transform_0, window_bounds = array<i64: 1, 1, 8, 8, 32>}, {transform_indices = @transform_1, window_bounds = array<i64: 1, 1, 8, 2, 8, 64>}]} {
    %c0 = arith.constant 0 : index
    %c0_0 = arith.constant 0 : index
    %c0_1 = arith.constant 0 : index
    %c0_2 = arith.constant 0 : index
    %c0_3 = arith.constant 0 : index
    %0 = vector.load %arg2[%c0, %c0_0, %c0_1, %c0_2, %c0_3] : memref<1x1x8x8x32xf32, #tpu.memory_space<vmem>>, vector<1x1x8x8x32xf32>
    %1 = vector.shape_cast %0 : vector<1x1x8x8x32xf32> to vector<8x8x32xf32>
    %c0_4 = arith.constant 0 : index
    %c0_5 = arith.constant 0 : index
    %c0_6 = arith.constant 0 : index
    %c0_7 = arith.constant 0 : index
    %c0_8 = arith.constant 0 : index
    %c0_9 = arith.constant 0 : index
    %2 = vector.load %arg3[%c0_4, %c0_5, %c0_6, %c0_7, %c0_8, %c0_9] : memref<1x1x8x2x8x64xf32, #tpu.memory_space<vmem>>, vector<1x1x8x1x8x32xf32>
    %3 = vector.shape_cast %2 : vector<1x1x8x1x8x32xf32> to vector<8x8x32xf32>
    %4 = vector.shape_cast %1 : vector<8x8x32xf32> to vector<1x1x8x1x8x32xf32>
    tpu.vector_store %arg3[%c0_4, %c0_5, %c0_6, %c0_7, %c0_8, %c0_9], %4 {strides = array<i32>} : memref<1x1x8x2x8x64xf32, #tpu.memory_space<vmem>>, vector<1x1x8x1x8x32xf32>,
    %c0_10 = arith.constant 0 : index
    %c0_11 = arith.constant 0 : index
    %c0_12 = arith.constant 0 : index
    %c0_13 = arith.constant 0 : index
    %c0_14 = arith.constant 0 : index
    %c32 = arith.constant 32 : index
    %5 = vector.load %arg3[%c0_10, %c0_11, %c0_12, %c0_13, %c0_14, %c32] : memref<1x1x8x2x8x64xf32, #tpu.memory_space<vmem>>, vector<1x1x8x1x8x32xf32>
    %6 = vector.shape_cast %5 : vector<1x1x8x1x8x32xf32> to vector<8x8x32xf32>
    %7 = vector.shape_cast %1 : vector<8x8x32xf32> to vector<1x1x8x1x8x32xf32>
    tpu.vector_store %arg3[%c0_10, %c0_11, %c0_12, %c0_13, %c0_14, %c32], %7 {strides = array<i32>} : memref<1x1x8x2x8x64xf32, #tpu.memory_space<vmem>>, vector<1x1x8x1x8x32xf32>,
    %c0_15 = arith.constant 0 : index
    %c0_16 = arith.constant 0 : index
    %c0_17 = arith.constant 0 : index
    %c1 = arith.constant 1 : index
    %c0_18 = arith.constant 0 : index
    %c0_19 = arith.constant 0 : index
    %8 = vector.load %arg3[%c0_15, %c0_16, %c0_17, %c1, %c0_18, %c0_19] : memref<1x1x8x2x8x64xf32, #tpu.memory_space<vmem>>, vector<1x1x8x1x8x32xf32>
    %9 = vector.shape_cast %8 : vector<1x1x8x1x8x32xf32> to vector<8x8x32xf32>
    %10 = vector.shape_cast %1 : vector<8x8x32xf32> to vector<1x1x8x1x8x32xf32>
    tpu.vector_store %arg3[%c0_15, %c0_16, %c0_17, %c1, %c0_18, %c0_19], %10 {strides = array<i32>} : memref<1x1x8x2x8x64xf32, #tpu.memory_space<vmem>>, vector<1x1x8x1x8x32xf32>,
    %c0_20 = arith.constant 0 : index
    %c0_21 = arith.constant 0 : index
    %c0_22 = arith.constant 0 : index
    %c1_23 = arith.constant 1 : index
    %c0_24 = arith.constant 0 : index
    %c32_25 = arith.constant 32 : index
    %11 = vector.load %arg3[%c0_20, %c0_21, %c0_22, %c1_23, %c0_24, %c32_25] : memref<1x1x8x2x8x64xf32, #tpu.memory_space<vmem>>, vector<1x1x8x1x8x32xf32>
    %12 = vector.shape_cast %11 : vector<1x1x8x1x8x32xf32> to vector<8x8x32xf32>
    %13 = vector.shape_cast %1 : vector<8x8x32xf32> to vector<1x1x8x1x8x32xf32>
    tpu.vector_store %arg3[%c0_20, %c0_21, %c0_22, %c1_23, %c0_24, %c32_25], %13 {strides = array<i32>} : memref<1x1x8x2x8x64xf32, #tpu.memory_space<vmem>>, vector<1x1x8x1x8x32xf32>,
    return
  }
  func.func @transform_0(%arg0: i32, %arg1: i32) -> (i32, i32, i32, i32, i32) {
    %c0_i32 = arith.constant 0 : i32
    %c0_i32_0 = arith.constant 0 : i32
    %c0_i32_1 = arith.constant 0 : i32
    %c0_i32_2 = arith.constant 0 : i32
    return %arg0, %arg1, %c0_i32, %c0_i32_0, %c0_i32_1 : i32, i32, i32, i32, i32
  }
  func.func @transform_1(%arg0: i32, %arg1: i32) -> (i32, i32, i32, i32, i32, i32) {
    %c0_i32 = arith.constant 0 : i32
    %c0_i32_0 = arith.constant 0 : i32
    %c0_i32_1 = arith.constant 0 : i32
    %c0_i32_2 = arith.constant 0 : i32
    %c0_i32_3 = arith.constant 0 : i32
    return %arg0, %arg1, %c0_i32, %c0_i32_0, %c0_i32_1, %c0_i32_2 : i32, i32, i32, i32, i32, i32
  }
}

</mosaic_0001>

<bundles_post_ra>
// kernel: upsample3d_forward.1
= control target key start
LH: loop header
LB: loop body
LE: loop exit
PB: predicated region body
PF: predicated region fallthrough
CT: control target
= control target key end

     0   :  { %6 = vsyncpa [#allocation3], 0  ;;  %s783_s0 = inlined_call_operand.hbm [shape: f32[2,3,8,8,32], index: 0, kind: input, shape index: {}]   ;;  %s784_s1 = inlined_call_operand.vmem [shape: f32[2,3,8,2,8,64], index: 1, kind: output, shape index: {}]  }
   0x1   :  { %8 = vsyncpa [#allocation3 + $0x1], 0  ;;  %s556_s6 = smov 0   ;;  %s558_s7 = smov 0  }
   0x2   :  { %s560_s8 = smov 0   ;;  %s562_s9 = smov 0  }
   0x3   :  { %s564_s10 = smov 0   ;;  %s566_s11 = smov 0  }
   0x4   :  { %s568_s12 = smov 0   ;;  %s570_s13 = smov 0  }
   0x5 LB: > { %s339_s14 = sadd.s32 4294967295, %s540_s13   ;;  %s23_s15 = sadd.s32 1, %s532_s11  ;;  %s540_s13 = sphi %s570_s13, %s14_s13   ;;  %s536_s12 = sphi %s568_s12, %s795_s12   ;;  %s532_s11 = sphi %s566_s11, %s794_s11   ;;  %s528_s10 = sphi %s564_s10, %s793_s10   ;;  %s524_s9 = sphi %s562_s9, %s792_s9   ;;  %s520_s8 = sphi %s560_s8, %s791_s8   ;;  %s516_s7 = sphi %s558_s7, %s790_s7   ;;  %s512_s6 = sphi %s556_s6, %s789_s6  }
   0x6   : > { %p24_p0 = scmp.ge.s32.totalorder %s23_s15, 3  ;;  %s26_s16 = sadd.s32 1, %s536_s12 }
   0x7   : > { %s35_s17 = sadd.s32 1, %s520_s8  ;;  %p42_p1 = scmp.ne.s32.totalorder %s520_s8, %s516_s7 }
   0x8   : > { %s797_s15 = smov (%p24_p0, %s23_s15), 0  ;;  %s799_s16 = smov (!%p24_p0, %s26_s16), %s536_s12 }
   0x9   : > { %s31_s18 = ssub.s32 %s532_s11, %s797_s15  ;;  %p43_p2 = scmp.eq.s32.totalorder %s540_s13, 0 }
   0xa   : > { %p28_p3 = scmp.ge.s32.totalorder %s799_s16, 2  ;;  %p48_p4 = scmp.ne.s32.totalorder %s516_s7, %s512_s6 }
   0xb   : > { %p607_p5 = por %p43_p2, %p42_p1  ;;  %p49_p6 = scmp.eq.s32.totalorder %s339_s14, 0 }
   0xc   : > { %s801_s16 = smov (%p28_p3, %s799_s16), 0  ;;  %p376_p8 = scmp.lt.s32.totalorder %s540_s13, 6 }
   0xd   : > { %p613_p7 = por %p49_p6, %p48_p4  ;;  %s30_s21 = ssub.s32 %s536_s12, %s801_s16 }
   0xe   : > { %s32_s22 = sor.u32 %s31_s18, %s30_s21  ;;  %s100_s23 = sand.u32 1, %s520_s8  }
   0xf   : > { %p33_p9 = scmp.eq.s32.totalorder %s32_s22, 0  ;;  %s343_s24 = sshll.u32 %s100_s23, 6 }
  0x10   : > { %s344_s25 = sshll.u32 %s532_s11, 3  ;;  %s368_s27 = smul.u32 24, %s536_s12 }
  0x11   : > { %s623_s26 = scalar_select %p33_p9, %s520_s8, %s35_s17  }
  0x12   : > { %s104_s28 = scalar_lea.vmem [#allocation2], %s343_s24  ;;  %p628_p10 = pnand %p376_p8, %p607_p5 }
  0x13   : > { %s113_s29 = sshll.u32 %s104_s28, 4  ;;  %s110_s2 = sadd.s32 %s368_s27, %s344_s25  ;;  %s632_s29 = int_to_ptr.vmem [resolvable:$true] %s113_s29 }
  0x14   : > { %s345_s3 = sshll.u32 %s110_s2, 7  ;;  %s640_s14 = scalar_lea.sflag [#allocation3], %s100_s23 }
  0x15   : > { %s637_s6 = scalar_lea.hbm %s783_s0, %s345_s3  ;;  %p446_p13 = pneg %p628_p10 }
  0x16   : > { %s444_s17 = scalar_lea.hbm %s637_s6, 1024  ;;  %s449_s21 = scalar_lea.hbm %s783_s0, 6144 }
  0x17   : > { %p445_p12 = scmp.ne.s32.totalorder %s637_s6, %s444_s17  ;;  %p450_p2 = scmp.lt.u32.totalorder %s637_s6, %s783_s0 }
  0x18   : > { %p451_p3 = scmp.lt.u32.totalorder %s449_s21, %s444_s17  ;;  %p453_p5 = scmp.lt.u32.totalorder %s444_s17, %s637_s6 }
  0x19   : > { %p447_p0 = pnand %p446_p13, %p445_p12 }
  0x1a   : > { %p452_p4 = por %p451_p3, %p450_p2 }
  0x1b   : > { %p448_p1 = pneg %p447_p0 }
  0x1c   : > { %p454_p6 = por %p453_p5, %p452_p4 }
  0x1e   : > { %p455_p8 = pnand %p454_p6, %p448_p1 }
  0x20   : > { %458 = shalt.err (!%p455_p8)
}
  0x21   : > { %s459_s23 = scalar_lea.vmem %s632_s29, 1024  ;;  %s542_s25 = smov [#allocation2]  }
  0x22   : > { %p460_p9 = scmp.ne.s32.totalorder %s632_s29, %s459_s23  ;;  %s464_s27 = sshll.u32 %s542_s25, 4  ;;  %s465_s27 = int_to_ptr.vmem [resolvable:$false] %s464_s27 }
  0x23   : > { %s466_s28 = scalar_lea.vmem %s465_s27, 2048  ;;  %p467_p11 = scmp.lt.s32.totalorder %s632_s29, %s465_s27 }
  0x24   : > { %p462_p12 = pnand %p460_p9, %p446_p13  ;;  %p468_p2 = scmp.lt.s32.totalorder %s466_s28, %s459_s23 }
  0x26   : > { %p463_p0 = pneg %p462_p12  ;;  %p469_p3 = por %p468_p2, %p467_p11 }
  0x28   : > { %p470_p4 = pnand %p469_p3, %p463_p0 }
  0x2a   : > { %473 = shalt.err (!%p470_p4)
}
  0x2b   : > { %s543_s2 = smov 128   ;;  %s544_s3 = smov 8  }
  0x2c   : > { %375 = dma.hbm_to_vmem [thread:$0]  (!%p628_p10), %s637_s6, 1024, %s632_s29, %s640_s14, %s543_s2, %s543_s2, %s544_s3  }
  0x2d   : > { %p121_p13 = scmp.lt.s32.totalorder %s540_s13, 7  ;;  %p788_p1 = scmp.ge.s32.totalorder %s540_s13, 1 }
  0x2f   : > { %p122_p5 = pnand %p788_p1, %p121_p13 }
  0x30   : > { %s127_s4 = sand.u32 (!%p122_p5), 1, %s516_s7  }
  0x31   : > { %125 = sbr.rel (%p122_p5) target bundleno = 191 (0xbf), region = 24  ;;  %s347_s5 = sshll.u32 (!%p122_p5), %s127_s4, 6 }
  0x32   : > { %s128_s17 = scalar_lea.sflag (!%p122_p5), [#allocation3], %s127_s4  ;;  %s672_s18 = scalar_lea.vmem (!%p122_p5), [#allocation2], %s347_s5 }
  0x38   : > { %507 = dma.done.wait (%p613_p7), %s128_s17, 1024  }
  0x39   : > { %509 = vsyncadd (%p613_p7), %s128_s17, 4294966272  ;;  %p154_p10 = scmp.lt.s32.totalorder %s528_s10, 1  ;;  %p156_p11 = scmp.lt.s32.totalorder %s524_s9, 2  ;;  %vm171_vm0 = vcmask 261120   ;;  %v165_v0 = vld [vmem:[%s672_s18 + $0x10] sm:$0xff]  ;;  %v163_v1 = vld [vmem:[%s672_s18] sm:$0xff] }
  0x3a   : > { %v166_v2 = vld [vmem:[%s672_s18 + $0x18] sm:$0xff]  ;;  %v164_v3 = vld [vmem:[%s672_s18 + $0x8] sm:$0xff]  ;;  %v167_v5 = vld [vmem:[%s672_s18 + $0x20] sm:$0xff]  ;;  %vm212_vm1 = vcmask 523520  }
  0x3b   : > { %s803_s10 = smov (!%p154_p10, %s528_s10), 1  ;;  %s805_s9 = smov (!%p156_p11, %s524_s9), 2  ;;  %v168_v4 = vld [vmem:[%s672_s18 + $0x28] sm:$0xff]  ;;  %v170_v6 = vld [vmem:[%s672_s18 + $0x38] sm:$0xff]  ;;  %v169_v7 = vld [vmem:[%s672_s18 + $0x30] sm:$0xff] }
  0x3c   : > { %s369_s29 = smul.u32 48, %s803_s10  ;;  %s348_s30 = sshll.u32 %s805_s9, 4 }
  0x3d   : > { %s545_s9 = smov 32  }
  0x3e   : > { %s160_s6 = sadd.s32 %s369_s29, %s348_s30  ;;  %192 = vrot.lane.b32.xlu1 %v165_v0, %s545_s9  ;;  %188 = vrot.lane.b32.xlu0 %v163_v1, %s545_s9 }
  0x3f   : > { %s349_s14 = sshll.u32 %s160_s6, 3 }
  0x40   : > { %s688_s21 = scalar_lea.vmem %s784_s1, %s349_s14 }
  0x41   : > { %174 = vst.msk [vmem:[%s688_s21 + $0x20] sm:$0xff] %vm171_vm0, %v165_v0  ;;  %352 = vst.msk [vmem:[%s688_s21 + $0x28] sm:$0xff] %vm171_vm0, %v165_v0 }
  0x42   : > { %172 = vst.msk [vmem:[%s688_s21] sm:$0xff] %vm171_vm0, %v163_v1  ;;  %350 = vst.msk [vmem:[%s688_s21 + $0x8] sm:$0xff] %vm171_vm0, %v163_v1  ;;  %194 = vrot.lane.b32.xlu1 %v166_v2, %s545_s9  ;;  %190 = vrot.lane.b32.xlu0 %v164_v3, %s545_s9 }
  0x43   : > { %175 = vst.msk [vmem:[%s688_s21 + $0x30] sm:$0xff] %vm171_vm0, %v166_v2  ;;  %353 = vst.msk [vmem:[%s688_s21 + $0x38] sm:$0xff] %vm171_vm0, %v166_v2 }
  0x44   : > { %173 = vst.msk [vmem:[%s688_s21 + $0x10] sm:$0xff] %vm171_vm0, %v164_v3  ;;  %351 = vst.msk [vmem:[%s688_s21 + $0x18] sm:$0xff] %vm171_vm0, %v164_v3 }
  0x45   : > { %177 = vst.msk [vmem:[%s688_s21 + $0x50] sm:$0xff] %vm171_vm0, %v168_v4  ;;  %355 = vst.msk [vmem:[%s688_s21 + $0x58] sm:$0xff] %vm171_vm0, %v168_v4 }
  0x46   : > { %176 = vst.msk [vmem:[%s688_s21 + $0x40] sm:$0xff] %vm171_vm0, %v167_v5  ;;  %354 = vst.msk [vmem:[%s688_s21 + $0x48] sm:$0xff] %vm171_vm0, %v167_v5  ;;  %198 = vrot.lane.b32.xlu1 %v168_v4, %s545_s9  ;;  %196 = vrot.lane.b32.xlu0 %v167_v5, %s545_s9 }
  0x47   : > { %179 = vst.msk [vmem:[%s688_s21 + $0x70] sm:$0xff] %vm171_vm0, %v170_v6  ;;  %357 = vst.msk [vmem:[%s688_s21 + $0x78] sm:$0xff] %vm171_vm0, %v170_v6 }
  0x48   : > { %178 = vst.msk [vmem:[%s688_s21 + $0x60] sm:$0xff] %vm171_vm0, %v169_v7  ;;  %356 = vst.msk [vmem:[%s688_s21 + $0x68] sm:$0xff] %vm171_vm0, %v169_v7 }
  0x4a   : > { %202 = vrot.lane.b32.xlu1 %v170_v6, %s545_s9  ;;  %200 = vrot.lane.b32.xlu0 %v169_v7, %s545_s9 }
  0xb0   : > { %v193_v8 = vpop.permute.xlu1 %192  ;;  %v189_v9 = vpop.permute.xlu0 %188 }
  0xb1   : > { %215 = vst.msk [vmem:[%s688_s21 + $0x20] sm:$0xff] %vm212_vm1, %v193_v8  ;;  %360 = vst.msk [vmem:[%s688_s21 + $0x28] sm:$0xff] %vm212_vm1, %v193_v8 }
  0xb2   : > { %213 = vst.msk [vmem:[%s688_s21] sm:$0xff] %vm212_vm1, %v189_v9  ;;  %358 = vst.msk [vmem:[%s688_s21 + $0x8] sm:$0xff] %vm212_vm1, %v189_v9 }
  0xb4   : > { %v195_v10 = vpop.permute.xlu1 %194  ;;  %v191_v11 = vpop.permute.xlu0 %190 }
  0xb5   : > { %216 = vst.msk [vmem:[%s688_s21 + $0x30] sm:$0xff] %vm212_vm1, %v195_v10  ;;  %361 = vst.msk [vmem:[%s688_s21 + $0x38] sm:$0xff] %vm212_vm1, %v195_v10 }
  0xb6   : > { %214 = vst.msk [vmem:[%s688_s21 + $0x10] sm:$0xff] %vm212_vm1, %v191_v11  ;;  %359 = vst.msk [vmem:[%s688_s21 + $0x18] sm:$0xff] %vm212_vm1, %v191_v11 }
  0xb8   : > { %v199_v12 = vpop.permute.xlu1 %198  ;;  %v197_v13 = vpop.permute.xlu0 %196 }
  0xb9   : > { %218 = vst.msk [vmem:[%s688_s21 + $0x50] sm:$0xff] %vm212_vm1, %v199_v12  ;;  %363 = vst.msk [vmem:[%s688_s21 + $0x58] sm:$0xff] %vm212_vm1, %v199_v12 }
  0xba   : > { %217 = vst.msk [vmem:[%s688_s21 + $0x40] sm:$0xff] %vm212_vm1, %v197_v13  ;;  %362 = vst.msk [vmem:[%s688_s21 + $0x48] sm:$0xff] %vm212_vm1, %v197_v13 }
  0xbc   : > { %v203_v14 = vpop.permute.xlu1 %202  ;;  %v201_v15 = vpop.permute.xlu0 %200 }
  0xbd   : > { %220 = vst.msk [vmem:[%s688_s21 + $0x70] sm:$0xff] %vm212_vm1, %v203_v14  ;;  %365 = vst.msk [vmem:[%s688_s21 + $0x78] sm:$0xff] %vm212_vm1, %v203_v14 }
  0xbe   : > { %219 = vst.msk [vmem:[%s688_s21 + $0x60] sm:$0xff] %vm212_vm1, %v201_v15  ;;  %364 = vst.msk [vmem:[%s688_s21 + $0x68] sm:$0xff] %vm212_vm1, %v201_v15 }
  0xbf PF: > { %s14_s13 = sadd.s32 1, %s540_s13   ;;  %s789_s6 = smov %s516_s7 }
  0xc0   : > { %p11_p7 = scmp.ge.s32.totalorder %s14_s13, 8   ;;  %s790_s7 = smov %s520_s8 }
  0xc1   : > { %s791_s8 = smov %s623_s26  ;;  %s792_s9 = smov %s532_s11 }
  0xc2   : > { %s793_s10 = smov %s536_s12  ;;  %s794_s11 = smov %s797_s15 }
  0xc3   : > { %s795_s12 = smov %s801_s16  ;;  %13 = sbr.rel (!%p11_p7) target bundleno = 5 (0x5), region = 65 }
  0xca   :  { %267 = vsyncpa [#allocation3], 1 }
  0xcb   :  { %269 = vsyncpa [#allocation3 + $0x1], 1 }

</bundles_post_ra>
